<compile_context>
chip_gen: v7x
topology: tpu7x:2x2x1
jax: 0.10.0
libtpu: 0.0.40
codegen_flags: <defaults>
</compile_context>

<pallas_src>
import functools

import jax
import jax.numpy as jnp
from jax.experimental import pallas as pl
from jax.experimental.pallas import tpu as pltpu

LRELU_SLOPE = 0.2


def _round_up(x, m):
    return ((x + m - 1) // m) * m


# ----------------------------------------------------------------------------
# Pallas kernel: fused (optional leaky-relu on input) + matmul + bias
#   computes yT[N, tm] = wT[N, K] @ lrelu?(aT[K, tm]) + b[N, 1]
# ----------------------------------------------------------------------------
def _conv_matmul_kernel(w_ref, a_ref, b_ref, o_ref, *, apply_lrelu_input):
    a = a_ref[...]                                         # (K, tm) bf16
    if apply_lrelu_input:
        a = jnp.where(a >= 0, a, LRELU_SLOPE * a)          # fuse prev layer's act
    acc = jnp.dot(w_ref[...], a, preferred_element_type=jnp.float32)
    o_ref[...] = acc + b_ref[...]                          # (N, tm) f32 pre-activation


def conv_matmul(wT, aT, b, *, apply_lrelu_input, tm=512):
    """yT = wT @ leaky_relu?(aT) + b.

    wT: (N, K) weights, aT: (K, M) im2col patches (pre-activation values),
    b: (N,).  Returns (N, M) float32 pre-activation.
    """
    N, K = wT.shape
    _, M = aT.shape
    tm = min(tm, _round_up(M, 128))
    Mp = _round_up(M, tm)

    aT = aT.astype(jnp.bfloat16)
    if Mp != M:
        aT = jnp.pad(aT, ((0, 0), (0, Mp - M)))            # lane pad only (< 128*tm/128)
    wT = wT.astype(jnp.bfloat16)
    b2 = b.astype(jnp.float32).reshape(N, 1)

    kernel = functools.partial(_conv_matmul_kernel,
                               apply_lrelu_input=apply_lrelu_input)
    yT = pl.pallas_call(
        kernel,
        out_shape=jax.ShapeDtypeStruct((N, Mp), jnp.float32),
        grid=(Mp // tm,),
        in_specs=[
            pl.BlockSpec((N, K), lambda i: (0, 0)),        # full-dim block: no pad needed
            pl.BlockSpec((K, tm), lambda i: (0, i)),
            pl.BlockSpec((N, 1), lambda i: (0, 0)),
        ],
        out_specs=pl.BlockSpec((N, tm), lambda i: (0, i)),
        compiler_params=pltpu.CompilerParams(
            dimension_semantics=("parallel",)),
    )(wT, aT, b2)
    return yT[:, :M] if Mp != M else yT


# ----------------------------------------------------------------------------
# Conv2d on (C, B, H, W)-layout activations via im2col + Pallas matmul.
# Input `x` holds PRE-activation values; if apply_lrelu_input is True the
# leaky-relu is applied inside the kernel (elementwise, so it commutes with
# zero/reflect padding and with the im2col gather).
# ----------------------------------------------------------------------------
def conv2d_cbhw(x, w, b, stride, padding, pad_mode, apply_lrelu_input):
    Cin, B, H, W = x.shape
    Cout, _, KH, KW = w.shape
    sh, sw = stride
    ph, pw = padding
    mode = "constant" if pad_mode == "zero" else "reflect"
    xp = jnp.pad(x, ((0, 0), (0, 0), (ph, ph), (pw, pw)), mode=mode)
    Hp, Wp = H + 2 * ph, W + 2 * pw
    Ho = (Hp - KH) // sh + 1
    Wo = (Wp - KW) // sw + 1
    patches = []
    for kh in range(KH):
        for kw in range(KW):
            patches.append(xp[:, :, kh:kh + sh * Ho:sh, kw:kw + sw * Wo:sw])
    # (Cin, KH*KW, B, Ho, Wo) -> (K, M) with NO transpose (carry layout is CBHW).
    aT = jnp.stack(patches, axis=1).reshape(Cin * KH * KW, B * Ho * Wo)
    wT = w.reshape(Cout, Cin * KH * KW)                    # (N, K)
    yT = conv_matmul(wT, aT, b, apply_lrelu_input=apply_lrelu_input)
    return yT.reshape(Cout, B, Ho, Wo)                     # (Cout, B, Ho, Wo) pre-act


# ----------------------------------------------------------------------------
# DiscriminatorP / MultiPeriodDiscriminator
# ----------------------------------------------------------------------------
def get_padding(kernel_size, dilation=1):
    return int((kernel_size * dilation - dilation) / 2)


def discriminator_p_forward(x, params, period):
    # x: (B, 1, T)
    B, C, T = x.shape
    if T % period != 0:
        n_pad = period - T % period
        x = jnp.pad(x, ((0, 0), (0, 0), (0, n_pad)), mode="reflect")
        T = T + n_pad
    x = x.reshape(B, C, T // period, period)               # NCHW
    x = jnp.transpose(x, (1, 0, 2, 3))                     # carry layout (C,B,H,W)
    fmap = []
    need_act = False
    n_convs = len(params["convs"])
    for i, (w, b) in enumerate(params["convs"]):
        kh = w.shape[2]
        sh = 3 if i < n_convs - 1 else 1                   # last conv of the list: stride 1
        y = conv2d_cbhw(x, w, b, (sh, 1), (get_padding(kh), 0), "zero", need_act)
        fmap.append(jnp.transpose(y, (1, 0, 2, 3)))        # pre-activation NCHW (matches ref)
        x = y
        need_act = True                                    # lrelu fused into next conv
    w, b = params["conv_post"]
    y = conv2d_cbhw(x, w, b, (1, 1), (1, 0), "zero", need_act)
    out = jnp.transpose(y, (1, 0, 2, 3)).reshape(B, -1)    # torch.flatten(x, 1, -1)
    return out, fmap


def mpd_forward(y, params, periods):
    outputs, fmaps = [], []
    for p, dp in zip(periods, params):
        o, f = discriminator_p_forward(y, dp, p)
        outputs.append(o)
        fmaps.append(f)
    return outputs, fmaps


# ----------------------------------------------------------------------------
# DiscriminatorR / MultiResolutionDiscriminator
# ----------------------------------------------------------------------------
def discriminator_r_forward(x_nchw, params):
    # x_nchw: (B, Cin, F, T')
    strides = [1, 2, 1, 2, 1, 2, 1]
    x = jnp.transpose(x_nchw, (1, 0, 2, 3))                # carry layout (C,B,H,W)
    hiddens = []
    need_act = False
    for (w, b), s in zip(params, strides):
        y = conv2d_cbhw(x, w, b, (s, s), (1, 1), "reflect", need_act)
        hiddens.append(jnp.transpose(y, (1, 0, 2, 3)))     # conv output (pre next-layer act)
        x = y
        need_act = True                                    # LeakyReLU at start of next block
    return hiddens[-1], hiddens[:-1]


def stft_mag_phase(x, fft_size, hop_size, win_size):
    # x: (B, T)
    # TODO(synk): TorchSTFT source is not provided; this is a plain center-padded
    # periodic-Hann rfft STFT with 1/sqrt(n_fft) normalization; mel_scale is not applied.
    pad = fft_size // 2
    xp = jnp.pad(x, ((0, 0), (pad, pad)), mode="reflect")
    n_frames = 1 + (xp.shape[1] - fft_size) // hop_size
    idx = jnp.arange(n_frames)[:, None] * hop_size + jnp.arange(fft_size)[None, :]
    frames = xp[:, idx]                                    # (B, n_frames, fft_size)
    n = jnp.arange(win_size)
    win = 0.5 * (1.0 - jnp.cos(2.0 * jnp.pi * n / win_size))
    spec = jnp.fft.rfft(frames * win, n=fft_size, axis=-1) / jnp.sqrt(
        jnp.asarray(win_size, jnp.float32))
    spec = jnp.swapaxes(spec, 1, 2)                        # (B, freq, n_frames)
    mag = jnp.abs(spec)
    phase = jnp.angle(spec)
    return mag, phase


def mrd_forward(y, params, hop_lengths):
    # domain == 'double': stack linear- and log-magnitude as two input channels.
    x = y[:, 0, :]                 # (B, T); equivalent to x.squeeze() for (B,1,T), robust to B==1
    scores, feats = [], []
    for hop, dp in zip(hop_lengths, params):
        mag, _phase = stft_mag_phase(x, hop * 4, hop, hop * 4)
        mag = jnp.concatenate([mag, jnp.log(jnp.maximum(mag, 1e-7))], axis=1)
        mag = jnp.stack(jnp.split(mag, 2, axis=1), axis=1)  # (B, 2, F, T')
        s, f = discriminator_r_forward(mag, dp)
        scores.append(s)
        feats.append(f)
    return scores, feats


# ----------------------------------------------------------------------------
# Top-level Discriminator
# ----------------------------------------------------------------------------
def discriminator_forward(y, params, periods, hop_lengths):
    if y.ndim == 2:
        y = y[:, None, :]
    mrd_outputs, mrd_fmaps = mrd_forward(y, params["mrd"], hop_lengths)
    mpd_outputs, mpd_fmaps = mpd_forward(y, params["mpd"], periods)
    return mrd_outputs + mpd_outputs, mrd_fmaps + mpd_fmaps


# ----------------------------------------------------------------------------
# Deterministic parameter init (weight_norm/spectral_norm are identity at init)
# ----------------------------------------------------------------------------
def init_conv(key, cout, cin, kh, kw):
    kwk, kbk = jax.random.split(key)
    fan_in = cin * kh * kw
    bound = 1.0 / (fan_in ** 0.5)
    w = jax.random.uniform(kwk, (cout, cin, kh, kw), jnp.float32, -bound, bound)
    b = jax.random.uniform(kbk, (cout,), jnp.float32, -bound, bound)
    return w, b


def init_discriminator_params(key, periods, mpd_ch, mpd_max_ch, hidden_channels):
    params = {"mpd": [], "mrd": []}
    for _p in periods:
        ch1 = mpd_ch
        ch2 = mpd_ch * 4
        ch3 = min(mpd_max_ch, mpd_ch * 16)
        ch4 = min(mpd_max_ch, mpd_ch * 32)
        chans = [(1, ch1), (ch1, ch2), (ch2, ch3), (ch3, ch4), (ch4, ch4)]
        convs = []
        for cin, cout in chans:
            key, sub = jax.random.split(key)
            convs.append(init_conv(sub, cout, cin, 5, 1))
        key, sub = jax.random.split(key)
        conv_post = init_conv(sub, 1, ch4, 3, 1)
        params["mpd"].append({"convs": convs, "conv_post": conv_post})
    for hidden in hidden_channels:
        chans = [(2, hidden // 32), (hidden // 32, hidden // 16),
                 (hidden // 16, hidden // 8), (hidden // 8, hidden // 4),
                 (hidden // 4, hidden // 2), (hidden // 2, hidden),
                 (hidden, 1)]
        layers = []
        for cin, cout in chans:
            key, sub = jax.random.split(key)
            layers.append(init_conv(sub, cout, cin, 3, 3))
        params["mrd"].append(layers)
    return params


if __name__ == "__main__":
    key = jax.random.PRNGKey(0)
    k_data, k_params = jax.random.split(key)

    # Small, forward-consistent config
    B, T = 2, 64
    periods = [2, 3, 5]                 # MultiPeriodDiscriminator periods
    mpd_channels, mpd_max_channels = 4, 16
    hop_lengths = [4, 8]                # MultiResolutionDiscriminator hops
    hidden_channels = [32, 32]

    y = (jax.random.normal(k_data, (B, T), jnp.float32) * 0.1)
    params = init_discriminator_params(
        k_params, periods, mpd_channels, mpd_max_channels, hidden_channels)

    outputs, fmaps = discriminator_forward(y, params, periods, hop_lengths)
    jax.block_until_ready((outputs, fmaps))
    print("KERNEL_OK")
</pallas_src>

<mosaic_0001>
module attributes {stable_mosaic.version = 11 : i64} {
  func.func @_conv_matmul_kernel(%arg0: i32, %arg1: memref<1x18xbf16, #tpu.memory_space<vmem>>, %arg2: memref<18x384xbf16, #tpu.memory_space<vmem>>, %arg3: memref<1x1xf32, #tpu.memory_space<vmem>>, %arg4: memref<1x384xf32, #tpu.memory_space<vmem>>) attributes {dimension_semantics = [#tpu.dimension_semantics<parallel>], iteration_bounds = array<i64: 1>, scalar_prefetch = 0 : i64, scratch_operands = 0 : i64, tpu.core_type = #tpu.core_type<tc>, window_params = [{pipeline_mode = #tpu.pipeline_mode<synchronous>, transform_indices = @transform_0, window_bounds = array<i64: 1, 18>}, {transform_indices = @transform_1, window_bounds = array<i64: 18, 384>}, {pipeline_mode = #tpu.pipeline_mode<synchronous>, transform_indices = @transform_2, window_bounds = array<i64: 1, 1>}, {transform_indices = @transform_3, window_bounds = array<i64: 1, 384>}]} {
    %c0 = arith.constant 0 : index
    %c0_0 = arith.constant 0 : index
    %0 = vector.load %arg2[%c0, %c0_0] : memref<18x384xbf16, #tpu.memory_space<vmem>>, vector<18x384xbf16>
    %c0_1 = arith.constant 0 : index
    %c0_2 = arith.constant 0 : index
    %1 = vector.load %arg1[%c0_1, %c0_2] : memref<1x18xbf16, #tpu.memory_space<vmem>>, vector<1x18xbf16>
    %cst = arith.constant dense<0.000000e+00> : vector<1x384xf32>
    %2 = tpu.matmul %1, %0, %cst {dimension_numbers = #tpu.dot_dimension_numbers<[1], [0], [0], [1], [0, 0, 1, 1], [], []>} : vector<1x18xbf16>, vector<18x384xbf16>, vector<1x384xf32> -> vector<1x384xf32>
    %c0_3 = arith.constant 0 : index
    %c0_4 = arith.constant 0 : index
    %3 = vector.load %arg3[%c0_3, %c0_4] : memref<1x1xf32, #tpu.memory_space<vmem>>, vector<1x1xf32>
    %4 = vector.broadcast %3 : vector<1x1xf32> to vector<1x384xf32>
    %5 = arith.addf %2, %4 : vector<1x384xf32>
    %c0_5 = arith.constant 0 : index
    %c0_6 = arith.constant 0 : index
    %6 = vector.load %arg4[%c0_5, %c0_6] : memref<1x384xf32, #tpu.memory_space<vmem>>, vector<1x384xf32>
    tpu.vector_store %arg4[%c0_5, %c0_6], %5 {strides = array<i32>} : memref<1x384xf32, #tpu.memory_space<vmem>>, vector<1x384xf32>,
    return
  }
  func.func @transform_0(%arg0: i32) -> (i32, i32) {
    %c0_i32 = arith.constant 0 : i32
    %c0_i32_0 = arith.constant 0 : i32
    %c0_i32_1 = arith.constant 0 : i32
    return %c0_i32, %c0_i32_0 : i32, i32
  }
  func.func @transform_1(%arg0: i32) -> (i32, i32) {
    %c0_i32 = arith.constant 0 : i32
    %c0_i32_0 = arith.constant 0 : i32
    return %c0_i32, %arg0 : i32, i32
  }
  func.func @transform_2(%arg0: i32) -> (i32, i32) {
    %c0_i32 = arith.constant 0 : i32
    %c0_i32_0 = arith.constant 0 : i32
    %c0_i32_1 = arith.constant 0 : i32
    return %c0_i32, %c0_i32_0 : i32, i32
  }
  func.func @transform_3(%arg0: i32) -> (i32, i32) {
    %c0_i32 = arith.constant 0 : i32
    %c0_i32_0 = arith.constant 0 : i32
    return %c0_i32, %arg0 : i32, i32
  }
}

</mosaic_0001>

<bundles_post_ra>
// kernel: tpu_custom_call.1
= control target key start
LH: loop header
LB: loop body
LE: loop exit
PB: predicated region body
PF: predicated region fallthrough
CT: control target
= control target key end

     0   :  { %s357_s0 = inlined_call_operand.vmem [shape: bf16[1,18], index: 0, kind: input, shape index: {}]   ;;  %s358_s1 = inlined_call_operand.hbm [shape: bf16[18,384], index: 1, kind: input, shape index: {}]   ;;  %s359_s2 = inlined_call_operand.<no memory space> [shape: f32[1,1], index: 2, kind: input, shape index: {}]   ;;  %s360_s3 = inlined_call_operand.hbm [shape: f32[1,384], index: 3, kind: output, shape index: {}]  }
   0x1   :  { %v8_v0 = vstv %s359_s2 }
   0x2   :  { %9 = vst [vmem:[#allocation2] sm:$0x1] %v8_v0 }
   0x3   :  { %10 = vsyncpa [#allocation4], 0 }
   0x4   :  { %11 = vsyncpa [#allocation5], 0  ;;  %s299_s14 = smov [#allocation3]   ;;  %s251_s18 = scalar_lea.hbm %s358_s1, 576 }
   0x5   :  { %s19_s15 = sshll.u32 %s299_s14, 4  ;;  %p252_p0 = scmp.ne.s32.totalorder %s358_s1, %s251_s18  ;;  %s20_s15 = int_to_ptr.vmem [resolvable:$true] %s19_s15 }
   0x6   :  { %p255_p1 = scmp.lt.u32.totalorder %s251_s18, %s358_s1 }
   0x8   :  { %p257_p2 = pnand %p255_p1, %p252_p0 }
   0xa   :  { %260 = shalt.err (!%p257_p2)
}
   0xb   :  { %s261_s2 = scalar_lea.vmem %s20_s15, 576  ;;  %p266_p4 = scmp.lt.s32.totalorder %s20_s15, %s20_s15 }
   0xc   :  { %p262_p3 = scmp.ne.s32.totalorder %s20_s15, %s261_s2  ;;  %p267_p5 = scmp.lt.s32.totalorder %s261_s2, %s261_s2 }
   0xe   :  { %p268_p6 = por %p267_p5, %p266_p4 }
  0x10   :  { %p269_p7 = pnand %p268_p6, %p262_p3 }
  0x12   :  { %272 = shalt.err (!%p269_p7)
}
  0x13   :  { %s300_s23 = smov 192   ;;  %s301_s24 = smov 12  }
  0x14   :  { %25 = dma.hbm_to_vmem [thread:$0]  %s358_s1, 576, %s20_s15, [#allocation4], %s300_s23, %s300_s23, %s301_s24  }
  0x15   :  { %295 = dma.done.wait [#allocation4], 576  }
  0x16   :  { %296 = vsyncadd [#allocation4], 4294966720  ;;  %v302_v1 = vmov 0.0   ;;  %v303_v2 = vmov 0   ;;  %vm304_vm0 = vmmov 0   ;;  %vm77_vm1 = vcmask 1040384  }
  0x17   :  { %227 = vmatprep.subr.bf16.mxu1 %v302_v1  ;;  %119 = vmatprep.mubr.bf16.mxu0 %v303_v2  ;;  %v244_v3 = vld [vmem:[#allocation3 + $0x4] ss:$12 sps:$4 sm:$0xff]   ;;  %v246_v4 = vld [vmem:[#allocation3] ss:$12 sps:$4 sm:$0xff]   ;;  %v247_v5 = vld [vmem:[#allocation3 + $0x8] ss:$12 sps:$4 sm:$0xff]   ;;  %v45_v14 = vlaneseq }
  0x18   :  { %231 = vmatprep.mubr.msk.bf16.mxu1 %vm304_vm0, %v302_v1  ;;  %243 = vset.pattern.permute.xlu0 %v303_v2  ;;  %v36_v6 = vld [vmem:[#allocation3 + $0x18] sm:$0x11]  ;;  %v250_v9 = vld [vmem:[#allocation3 + $0x20] ss:$0 sps:$4 sm:$0x11]   ;;  %vm73_vm2 = vcmask 146432  }
  0x19   :  { %87 = vmatprep.subr.bf16.mxu0 %v244_v3  ;;  %v219_v7 = vcombine.high %v36_v6, %v36_v6  ;;  %v218_v8 = vcombine.low %v36_v6, %v36_v6  ;;  %228 = vmatpush3.bf16.msra.mxu1 %v247_v5  ;;  %v39_v10 = vld [vmem:[#allocation2] sm:$0x1]  ;;  %v85_v12 = vsel %vm77_vm1, %v250_v9, 0  ;;  %v46_v15 = vshrl.u32 %v45_v14, 7 }
  0x1a   :  { %88 = vmatpush1.bf16.msra.mxu0 %v246_v4  ;;  %229 = vmatprep.subr.bf16.mxu1 %v302_v1  ;;  %v38_v13 = vld [vmem:[%s357_s0] sm:$0x1]  ;;  %v305_v17 = vmov 1966171168   ;;  %s306_s0 = smov [#allocation6]   ;;  %vm197_vm3 = vcmp.lt.s32.totalorder %v45_v14, 384 }
  0x1b   :  { %221 = vmatprep.subr.msk.bf16.mxu0 %vm77_vm1, %v219_v7  ;;  %v79_v11 = vsel %vm77_vm1, %v218_v8, 0  ;;  %42 = vperm.xlu0 %243, %v39_v10   ;;  %v47_v16 = vsub.s32 0, %v46_v15  ;;  %v173_v18 = vunpack.c.l.s4 %v305_v17  ;;  %s206_s28 = sshll.u32 %s306_s0, 4  ;;  %s207_s28 = int_to_ptr.vmem [resolvable:$true] %s206_s28 }
  0x1c   :  { %s273_s29 = scalar_lea.vmem %s207_s28, 48  ;;  %s277_s30 = scalar_lea.vmem %s207_s28, 64 }
  0x1d   :  { %230 = vmatpush3.bf16.msra.mxu1 %v85_v12  ;;  %v174_v21 = vunpack.c.0.s8 %v173_v18  ;;  %p274_p8 = scmp.ne.s32.totalorder %s207_s28, %s273_s29  ;;  %p278_p9 = scmp.lt.s32.totalorder %s207_s28, %s207_s28 }
  0x1e   :  { %90 = vmatpush1.bf16.msra.mxu0 %v79_v11  ;;  %p279_p10 = scmp.lt.s32.totalorder %s277_s30, %s273_s29 }
  0x1f   :  { %v177_v26 = vsub.s32 %v174_v21, %v46_v15 }
  0x20   :  { %232 = vmatmul.mubr.msk.bf16.vlgmr.msra.gmra.mrb[0].mxu1 %vm73_vm2, %v38_v13  ;;  %p280_p11 = por %p279_p10, %p278_p9 }
  0x21   :  { %222 = vmatmul.mubr.msk.bf16.vlgmr.msra.gmra.mrb[0].mxu0 %vm73_vm2, %v38_v13 }
  0x22   :  { %p281_p12 = pnand %p280_p11, %p274_p8 }
  0x9a   :  { %v43_v19 = vpop.permute.xlu0 %42 }
  0x9b   :  { %v48_v20 = vrot.slane %v43_v19, %v47_v16 }
  0xf3   :  { %v162_v24 = vpop.f32.mrb[0].mxu1 }
  0xf4   :  { %v121_v22 = vpop.f32.mrb[0].mxu0  ;;  %v163_v27 = vadd.f32 %v162_v24, %v48_v20  ;;  %v233_v29 = vpop.f32.mrb[1].mxu1 }
  0xf5   :  { %v122_v23 = vadd.f32 %v121_v22, %v48_v20  ;;  %v123_v25 = vpop.f32.mrb[1].mxu0  ;;  %v165_v31 = vpop.f32.mrb[2].mxu1 }
  0xf6   :  { %v124_v28 = vadd.f32 %v123_v25, %v48_v20  ;;  %v125_v30 = vpop.f32.mrb[2].mxu0  ;;  %v234_v34 = vpop.f32.mrb[3].mxu1  ;;  %v185_v35 = vrot.slane %v163_v27, %v177_v26 }
  0xf7   :  { %v126_v32 = vpop.f32.mrb[3].mxu0 }
  0xf8   :  { %v171_v33 = vcombine.low %v122_v23, %v124_v28 }
  0xfa   :  { %v178_v36 = vrot.slane %v171_v33, %v177_v26 }
  0xfc   :  { %v186_v37 = vcombine.low %v178_v36, %v185_v35 }
  0xfe   :  { %v193_v38 = vrot.slane %v186_v37, %v177_v26 }
 0x100   :  { %199 = vst.msk [vmem:[#allocation6] sm:$0x7] %vm197_vm3, %v193_v38 }
 0x101   :  { %284 = shalt.err (!%p281_p12)
}
 0x102   :  { %s285_s6 = scalar_lea.hbm %s360_s3, 48 }
 0x103   :  { %p286_p13 = scmp.ne.s32.totalorder %s360_s3, %s285_s6  ;;  %p289_p0 = scmp.lt.u32.totalorder %s285_s6, %s360_s3 }
 0x105   :  { %p291_p1 = pnand %p289_p0, %p286_p13 }
 0x107   :  { %294 = shalt.err (!%p291_p1)
}
 0x108   :  { %209 = dma.vmem_to_hbm [thread:$0]  %s207_s28, 48, %s360_s3, [#allocation5]  }
 0x109   :  { %297 = dma.done.wait [#allocation5], 48  }
 0x10a   :  { %298 = vsyncadd [#allocation5], 4294967248 }
 0x10b   :  { %213 = vsyncpa [#allocation4], 1 }
 0x10c   :  { %214 = vsyncpa [#allocation5], 1 }

</bundles_post_ra>
